<compile_context>
chip_gen: v7x
topology: tpu7x:2x2x1
jax: 0.10.0
libtpu: 0.0.40
codegen_flags: <defaults>
</compile_context>

<pallas_src>
import jax
import jax.numpy as jnp
from jax.experimental import pallas as pl
from jax.experimental.pallas import tpu as pltpu


def _silu(v):
    # jax.nn.sigmoid lowers the exp + reciprocal onto the EUP slot.
    return v * jax.nn.sigmoid(v)


def egcl_kernel(rc_ref, ndf_ref, hw_ref, wA_ref, wC_ref, out_ref, acc_ref):
    f32 = jnp.float32
    bf16 = jnp.bfloat16

    T = rc_ref.shape[0]               # edges per tile
    N = ndf_ref.shape[0]              # nodes
    raw = wC_ref.shape[1]
    D = ndf_ref.shape[1] - raw
    hid = hw_ref.shape[1] // 2

    e_idx = pl.program_id(0)
    n_tiles = pl.num_programs(0)

    @pl.when(e_idx == 0)
    def _():
        acc_ref[...] = jnp.zeros_like(acc_ref)

    # ---- per-tile edge indices ------------------------------------------------
    rc = rc_ref[...]                                   # (T, 2) int32
    row = rc[:, 0:1]
    col = rc[:, 1:2]
    idx2 = jnp.concatenate([row, col], axis=0)         # (2T, 1): [rows; cols]

    # One stacked one-hot build for both gathers (and the scatter LHS).
    node_ids = jax.lax.broadcasted_iota(jnp.int32, (2 * T, N), 1)
    g2 = node_ids == idx2                              # (2T, N) bool; -1 pad -> all False
    g2_bf = g2.astype(bf16)
    g2_f32 = g2.astype(f32)

    # ---- node slabs -----------------------------------------------------------
    ndf = ndf_ref[...]                                 # (N, D+raw) f32 = [x | h]
    x = ndf[:, :D]
    h = ndf[:, D:]
    hw = hw_ref[...]                                   # (N, 2*hid) bf16 = [h@W1h | h@W1j]

    # Coordinates gathered in f32 (keeps coord_diff / sqr_dist at full precision).
    x2 = jnp.dot(g2_f32, x, preferred_element_type=f32)        # (2T, D)
    coord_diff = x2[:T] - x2[T:]                                # (T, D)
    sqr_dist = jnp.sum(coord_diff * coord_diff, axis=1, keepdims=True)

    # Precomputed node projections gathered in bf16 (f32 accumulation).
    hw2 = jnp.dot(g2_bf, hw, preferred_element_type=f32)       # (2T, 2*hid)
    m_lin = hw2[:T, :hid] + hw2[T:, hid:]                       # h[row]@W1h + h[col]@W1j

    # ---- static slices of the 8-aligned parameter slabs ----------------------
    wA = wA_ref[...]                                    # (4*hid + raw + tail, hid)
    o = 0
    w2 = wA[o:o + hid];   o += hid
    wt1 = wA[o:o + hid];  o += hid
    wt2 = wA[o:o + hid];  o += hid
    wp1m = wA[o:o + hid]; o += hid
    wp1h = wA[o:o + raw]; o += raw
    w1d = wA[o + 0:o + 1]
    b1  = wA[o + 1:o + 2]
    b2  = wA[o + 2:o + 3]
    bt1 = wA[o + 3:o + 4]
    bt2 = wA[o + 4:o + 5]
    bp1 = wA[o + 5:o + 6]
    wt3r = wA[o + 6:o + 7]                              # (1, hid)
    wC = wC_ref[...]
    wp2 = wC[:hid]
    bp2 = wC[hid:hid + 1]

    # ---- msg_mlp (input concat folded into precomputed / split weight blocks) -
    m = _silu(m_lin + sqr_dist * w1d + b1)
    msg = _silu(jnp.dot(m, w2, preferred_element_type=f32) + b2)       # (T, hid)

    # ---- trans_mlp ------------------------------------------------------------
    t = _silu(jnp.dot(msg, wt1, preferred_element_type=f32) + bt1)
    t = _silu(jnp.dot(t, wt2, preferred_element_type=f32) + bt2)
    t_scale = jnp.sum(t * wt3r, axis=1, keepdims=True)                 # VPU, not MXU
    trans = coord_diff * t_scale                                       # (T, D)

    # ---- fused segment reductions over `row`: [msg | trans | 1] --------------
    ones = jnp.ones((T, 1), f32)
    scat_in = jnp.concatenate([msg, trans, ones], axis=1).astype(bf16)  # (T, hid+D+1)
    g_row_bf = g2_bf[:T]                                                # (T, N)
    scat = jax.lax.dot_general(g_row_bf, scat_in, (((0,), (0,)), ((), ())),
                               preferred_element_type=f32)              # (N, hid+D+1)
    acc_ref[...] += scat

    # ---- finalize on the last edge tile ---------------------------------------
    @pl.when(e_idx == n_tiles - 1)
    def _():
        acc = acc_ref[...]
        msg_sum = acc[:, :hid]
        sum_trans = acc[:, hid:hid + D]
        count = acc[:, hid + D:hid + D + 1]

        inv_count = pl.reciprocal(jnp.maximum(count, 1.0), approx=True)
        x_out = x + sum_trans * inv_count                               # (N, D)

        p = _silu(jnp.dot(h, wp1h, preferred_element_type=f32)
                  + jnp.dot(msg_sum, wp1m, preferred_element_type=f32) + bp1)
        h_out = h + jnp.dot(p, wp2, preferred_element_type=f32) + bp2   # (N, raw)

        packed = jnp.concatenate([h_out, x_out], axis=1)
        pad_w = out_ref.shape[1] - packed.shape[1]
        if pad_w:  # static
            packed = jnp.concatenate(
                [packed, jnp.zeros((N, pad_w), f32)], axis=1)
        out_ref[...] = packed


def pack_params(params, raw, hid):
    """Pack 16 parameter arrays into two slabs with 8-aligned multi-row blocks."""
    (w1h, w1j, w1d, b1, w2, b2, wt1, bt1, wt2, bt2, wt3,
     wp1h, wp1m, bp1, wp2, bp2) = params
    # Multi-row blocks first (offsets are 8-aligned when raw % 8 == hid % 8 == 0);
    # all 1-row vectors live in a padded tail block.
    wA = jnp.concatenate([w2, wt1, wt2, wp1m, wp1h,
                          w1d, b1, b2, bt1, bt2, bp1, wt3.T], axis=0)
    pad = (-wA.shape[0]) % 8
    if pad:
        wA = jnp.concatenate([wA, jnp.zeros((pad, hid), jnp.float32)], axis=0)
    wC = jnp.concatenate([wp2, bp2], axis=0)
    pad = (-wC.shape[0]) % 8
    if pad:
        wC = jnp.concatenate([wC, jnp.zeros((pad, raw), jnp.float32)], axis=0)
    return wA, wC


def egcl_forward(params, edge_index, str_feature, coord_feature, *, tile_e=128):
    h = str_feature.astype(jnp.float32)
    x = coord_feature.astype(jnp.float32)
    N, raw = h.shape
    D = x.shape[1]
    (w1h, w1j, *_rest) = params
    hid = w1h.shape[1]
    # TODO(synk): general raw/hid need padded slab blocks; demo uses multiples of 8.

    # --- edges: pad to a tile multiple with out-of-range index -1 --------------
    tile_e = max(8, ((tile_e + 7) // 8) * 8)
    rc = edge_index.T.astype(jnp.int32)                        # (E, 2)
    E = rc.shape[0]
    e_pad = ((E + tile_e - 1) // tile_e) * tile_e
    if e_pad != E:
        rc = jnp.concatenate(
            [rc, jnp.full((e_pad - E, 2), -1, jnp.int32)], axis=0)
    n_tiles = e_pad // tile_e

    # --- node slabs -------------------------------------------------------------
    ndf = jnp.concatenate([x, h], axis=1)                      # (N, D+raw) f32
    hw = jnp.concatenate([h @ w1h, h @ w1j], axis=1).astype(jnp.bfloat16)  # (N, 2*hid)
    wA, wC = pack_params(params, raw, hid)

    out_w = max(128, ((raw + D + 127) // 128) * 128)           # lane-dense output

    out = pl.pallas_call(
        egcl_kernel,
        out_shape=jax.ShapeDtypeStruct((N, out_w), jnp.float32),
        grid=(n_tiles,),
        in_specs=[
            pl.BlockSpec((tile_e, 2), lambda e: (e, 0)),       # per-tile row/col
            pl.BlockSpec((N, D + raw), lambda e: (0, 0)),      # resident [x | h]
            pl.BlockSpec((N, 2 * hid), lambda e: (0, 0)),      # resident [hW1h | hW1j]
            pl.BlockSpec(wA.shape, lambda e: (0, 0)),          # resident weight slab
            pl.BlockSpec(wC.shape, lambda e: (0, 0)),          # resident weight slab
        ],
        out_specs=pl.BlockSpec((N, out_w), lambda e: (0, 0)),
        scratch_shapes=[pltpu.VMEM((N, hid + D + 1), jnp.float32)],
        compiler_params=pltpu.CompilerParams(
            dimension_semantics=("arbitrary",),                # carried accumulator
            vmem_limit_bytes=32 * 1024 * 1024,
        ),
    )(rc, ndf, hw, wA, wC)
    return out[:, :raw], out[:, raw:raw + D]


def init_params(key, raw_dim, hid_dim):
    """Deterministic synthetic init mimicking nn.Linear defaults (weights stored [in, out])."""
    ks = jax.random.split(key, 8)

    def linear(k, fan_in, fan_out):
        kw, kb = jax.random.split(k)
        bound = 1.0 / jnp.sqrt(jnp.float32(fan_in))
        w = jax.random.uniform(kw, (fan_in, fan_out), jnp.float32, -bound, bound)
        b = jax.random.uniform(kb, (1, fan_out), jnp.float32, -bound, bound)
        return w, b

    # msg_mlp
    w1, b1 = linear(ks[0], 2 * raw_dim + 1, hid_dim)
    w1h, w1j, w1d = w1[:raw_dim], w1[raw_dim:2 * raw_dim], w1[2 * raw_dim:]
    w2, b2 = linear(ks[1], hid_dim, hid_dim)
    # trans_mlp
    wt1, bt1 = linear(ks[2], hid_dim, hid_dim)
    wt2, bt2 = linear(ks[3], hid_dim, hid_dim)
    gain = 0.001
    xav = gain * jnp.sqrt(6.0 / jnp.float32(hid_dim + 1))      # xavier_uniform, gain=0.001
    wt3 = jax.random.uniform(ks[4], (hid_dim, 1), jnp.float32, -xav, xav)
    # posi_mlp
    wp1, bp1 = linear(ks[5], raw_dim + hid_dim, hid_dim)
    wp1h, wp1m = wp1[:raw_dim], wp1[raw_dim:]
    wp2, bp2 = linear(ks[6], hid_dim, raw_dim)
    return (w1h, w1j, w1d, b1, w2, b2,
            wt1, bt1, wt2, bt2, wt3,
            wp1h, wp1m, bp1, wp2, bp2)


def egcl_ref(params, edge_index, h, x):
    """Pure-JAX f32 reference matching the PyTorch forward."""
    (w1h, w1j, w1d, b1, w2, b2, wt1, bt1, wt2, bt2, wt3,
     wp1h, wp1m, bp1, wp2, bp2) = params
    row, col = edge_index[0], edge_index[1]
    N = h.shape[0]
    silu = lambda v: v * jax.nn.sigmoid(v)

    coord_diff = x[row] - x[col]
    sqr = jnp.sum(coord_diff ** 2, axis=1, keepdims=True)
    m = silu(h[row] @ w1h + h[col] @ w1j + sqr * w1d + b1)
    msg = silu(m @ w2 + b2)
    t = silu(msg @ wt1 + bt1)
    t = silu(t @ wt2 + bt2)
    t = t @ wt3
    trans = coord_diff * t
    sum_trans = jax.ops.segment_sum(trans, row, num_segments=N)
    count = jax.ops.segment_sum(jnp.ones_like(trans), row, num_segments=N)
    x_new = x + sum_trans / jnp.maximum(count, 1.0)
    msg_sum = jax.ops.segment_sum(msg, row, num_segments=N)
    o = silu(h @ wp1h + msg_sum @ wp1m + bp1)
    o = o @ wp2 + bp2
    return h + o, x_new


if __name__ == "__main__":
    key = jax.random.PRNGKey(0)
    N, E, raw_dim, hid_dim, D = 8, 32, 16, 32, 3
    kp, ke, kh, kx = jax.random.split(key, 4)

    params = init_params(kp, raw_dim, hid_dim)
    edge_index = jax.random.randint(ke, (2, E), 0, N, dtype=jnp.int32)
    str_feature = jax.random.normal(kh, (N, raw_dim), jnp.float32)
    coord_feature = jax.random.normal(kx, (N, D), jnp.float32)

    # tile_e=16 -> 2 edge tiles: exercises the cross-tile scatter accumulation.
    h_new, x_new = egcl_forward(params, edge_index, str_feature, coord_feature,
                                tile_e=16)
    jax.block_until_ready((h_new, x_new))

    h_ref, x_ref = egcl_ref(params, edge_index, str_feature, coord_feature)
    h_err = float(jnp.max(jnp.abs(h_new - h_ref)))
    x_err = float(jnp.max(jnp.abs(x_new - x_ref)))
    print(f"max |dh| = {h_err:.3e}  max |dx| = {x_err:.3e}")

    # Coordinates stay on an f32 path -> tight tolerance.
    assert jnp.allclose(x_new, x_ref, atol=1e-4, rtol=1e-4), "coord_feature mismatch"
    # h path uses bf16 MXU operands (gathered projections / scattered messages)
    # with f32 accumulation -> a few-1e-3 absolute error is expected.
    assert jnp.allclose(h_new, h_ref, atol=1e-2, rtol=1e-2), "str_feature mismatch"

    print("KERNEL_OK")
</pallas_src>

<mosaic_0001>
module attributes {stable_mosaic.version = 11 : i64} {
  func.func @egcl_kernel(%arg0: i32, %arg1: memref<16x2xi32, #tpu.memory_space<vmem>>, %arg2: memref<8x19xf32, #tpu.memory_space<vmem>>, %arg3: memref<8x64xbf16, #tpu.memory_space<vmem>>, %arg4: memref<152x32xf32, #tpu.memory_space<vmem>>, %arg5: memref<40x16xf32, #tpu.memory_space<vmem>>, %arg6: memref<8x128xf32, #tpu.memory_space<vmem>>, %arg7: memref<8x36xf32, #tpu.memory_space<vmem>>) attributes {dimension_semantics = [#tpu.dimension_semantics<arbitrary>], iteration_bounds = array<i64: 2>, scalar_prefetch = 0 : i64, scratch_operands = 1 : i64, tpu.core_type = #tpu.core_type<tc>, window_params = [{transform_indices = @transform_0, window_bounds = array<i64: 16, 2>}, {pipeline_mode = #tpu.pipeline_mode<synchronous>, transform_indices = @transform_1, window_bounds = array<i64: 8, 19>}, {pipeline_mode = #tpu.pipeline_mode<synchronous>, transform_indices = @transform_2, window_bounds = array<i64: 8, 64>}, {pipeline_mode = #tpu.pipeline_mode<synchronous>, transform_indices = @transform_3, window_bounds = array<i64: 152, 32>}, {pipeline_mode = #tpu.pipeline_mode<synchronous>, transform_indices = @transform_4, window_bounds = array<i64: 40, 16>}, {pipeline_mode = #tpu.pipeline_mode<synchronous>, transform_indices = @transform_5, window_bounds = array<i64: 8, 128>}]} {
    %c0_i32 = arith.constant 0 : i32
    %0 = arith.cmpi eq, %arg0, %c0_i32 : i32
    %1 = arith.extui %0 : i1 to i32
    %c0_i32_0 = arith.constant 0 : i32
    %2 = arith.cmpi ne, %1, %c0_i32_0 : i32
    scf.if %2 {
      %cst_27 = arith.constant 0.000000e+00 : f32
      %102 = vector.broadcast %cst_27 : f32 to vector<8x36xf32>
      %c0_28 = arith.constant 0 : index
      %c0_29 = arith.constant 0 : index
      %103 = vector.load %arg7[%c0_28, %c0_29] : memref<8x36xf32, #tpu.memory_space<vmem>>, vector<8x36xf32>
      tpu.vector_store %arg7[%c0_28, %c0_29], %102 {strides = array<i32>} : memref<8x36xf32, #tpu.memory_space<vmem>>, vector<8x36xf32>,
    } else {
    }
    %c0 = arith.constant 0 : index
    %c0_1 = arith.constant 0 : index
    %3 = vector.load %arg1[%c0, %c0_1] : memref<16x2xi32, #tpu.memory_space<vmem>>, vector<16x2xi32>
    %4 = vector.extract_strided_slice %3 {offsets = [0, 0], sizes = [16, 1], strides = [1, 1]} : vector<16x2xi32> to vector<16x1xi32>
    %5 = vector.extract_strided_slice %3 {offsets = [0, 1], sizes = [16, 1], strides = [1, 1]} : vector<16x2xi32> to vector<16x1xi32>
    %6 = tpu.concatenate %4, %5 in 0 : vector<16x1xi32>, vector<16x1xi32> -> vector<32x1xi32>
    %7 = tpu.iota {dimensions = array<i32: 1>} : vector<32x8xi32>
    %8 = vector.broadcast %6 : vector<32x1xi32> to vector<32x8xi32>
    %9 = arith.cmpi eq, %7, %8 : vector<32x8xi32>
    %10 = arith.extui %9 : vector<32x8xi1> to vector<32x8xi32>
    %11 = arith.sitofp %10 : vector<32x8xi32> to vector<32x8xf32>
    %12 = arith.truncf %11 : vector<32x8xf32> to vector<32x8xbf16>
    %13 = arith.extui %9 : vector<32x8xi1> to vector<32x8xi32>
    %14 = arith.sitofp %13 : vector<32x8xi32> to vector<32x8xf32>
    %c0_2 = arith.constant 0 : index
    %c0_3 = arith.constant 0 : index
    %15 = vector.load %arg2[%c0_2, %c0_3] : memref<8x19xf32, #tpu.memory_space<vmem>>, vector<8x19xf32>
    %16 = vector.extract_strided_slice %15 {offsets = [0, 0], sizes = [8, 3], strides = [1, 1]} : vector<8x19xf32> to vector<8x3xf32>
    %17 = vector.extract_strided_slice %15 {offsets = [0, 3], sizes = [8, 16], strides = [1, 1]} : vector<8x19xf32> to vector<8x16xf32>
    %c0_4 = arith.constant 0 : index
    %c0_5 = arith.constant 0 : index
    %18 = vector.load %arg3[%c0_4, %c0_5] : memref<8x64xbf16, #tpu.memory_space<vmem>>, vector<8x64xbf16>
    %cst = arith.constant dense<0.000000e+00> : vector<32x3xf32>
    %19 = tpu.matmul %14, %16, %cst {dimension_numbers = #tpu.dot_dimension_numbers<[1], [0], [0], [1], [0, 0, 1, 1], [], []>} : vector<32x8xf32>, vector<8x3xf32>, vector<32x3xf32> -> vector<32x3xf32>
    %20 = vector.extract_strided_slice %19 {offsets = [0, 0], sizes = [16, 3], strides = [1, 1]} : vector<32x3xf32> to vector<16x3xf32>
    %21 = vector.extract_strided_slice %19 {offsets = [16, 0], sizes = [16, 3], strides = [1, 1]} : vector<32x3xf32> to vector<16x3xf32>
    %22 = arith.subf %20, %21 : vector<16x3xf32>
    %23 = arith.mulf %22, %22 : vector<16x3xf32>
    %cst_6 = arith.constant dense<0.000000e+00> : vector<16xf32>
    %24 = vector.multi_reduction <add>, %23, %cst_6 [1] : vector<16x3xf32> to vector<16xf32>
    %25 = vector.shape_cast %24 : vector<16xf32> to vector<16x1xf32>
    %cst_7 = arith.constant dense<0.000000e+00> : vector<32x64xf32>
    %26 = tpu.matmul %12, %18, %cst_7 {dimension_numbers = #tpu.dot_dimension_numbers<[1], [0], [0], [1], [0, 0, 1, 1], [], []>} : vector<32x8xbf16>, vector<8x64xbf16>, vector<32x64xf32> -> vector<32x64xf32>
    %27 = vector.extract_strided_slice %26 {offsets = [0, 0], sizes = [16, 32], strides = [1, 1]} : vector<32x64xf32> to vector<16x32xf32>
    %28 = vector.extract_strided_slice %26 {offsets = [16, 32], sizes = [16, 32], strides = [1, 1]} : vector<32x64xf32> to vector<16x32xf32>
    %29 = arith.addf %27, %28 : vector<16x32xf32>
    %c0_8 = arith.constant 0 : index
    %c0_9 = arith.constant 0 : index
    %30 = vector.load %arg4[%c0_8, %c0_9] : memref<152x32xf32, #tpu.memory_space<vmem>>, vector<152x32xf32>
    %31 = vector.extract_strided_slice %30 {offsets = [0, 0], sizes = [32, 32], strides = [1, 1]} : vector<152x32xf32> to vector<32x32xf32>
    %32 = vector.extract_strided_slice %30 {offsets = [32, 0], sizes = [32, 32], strides = [1, 1]} : vector<152x32xf32> to vector<32x32xf32>
    %33 = vector.extract_strided_slice %30 {offsets = [64, 0], sizes = [32, 32], strides = [1, 1]} : vector<152x32xf32> to vector<32x32xf32>
    %34 = vector.extract_strided_slice %30 {offsets = [96, 0], sizes = [32, 32], strides = [1, 1]} : vector<152x32xf32> to vector<32x32xf32>
    %35 = vector.extract_strided_slice %30 {offsets = [128, 0], sizes = [16, 32], strides = [1, 1]} : vector<152x32xf32> to vector<16x32xf32>
    %36 = vector.extract_strided_slice %30 {offsets = [144, 0], sizes = [1, 32], strides = [1, 1]} : vector<152x32xf32> to vector<1x32xf32>
    %37 = vector.extract_strided_slice %30 {offsets = [145, 0], sizes = [1, 32], strides = [1, 1]} : vector<152x32xf32> to vector<1x32xf32>
    %38 = vector.extract_strided_slice %30 {offsets = [146, 0], sizes = [1, 32], strides = [1, 1]} : vector<152x32xf32> to vector<1x32xf32>
    %39 = vector.extract_strided_slice %30 {offsets = [147, 0], sizes = [1, 32], strides = [1, 1]} : vector<152x32xf32> to vector<1x32xf32>
    %40 = vector.extract_strided_slice %30 {offsets = [148, 0], sizes = [1, 32], strides = [1, 1]} : vector<152x32xf32> to vector<1x32xf32>
    %41 = vector.extract_strided_slice %30 {offsets = [149, 0], sizes = [1, 32], strides = [1, 1]} : vector<152x32xf32> to vector<1x32xf32>
    %42 = vector.extract_strided_slice %30 {offsets = [150, 0], sizes = [1, 32], strides = [1, 1]} : vector<152x32xf32> to vector<1x32xf32>
    %c0_10 = arith.constant 0 : index
    %c0_11 = arith.constant 0 : index
    %43 = vector.load %arg5[%c0_10, %c0_11] : memref<40x16xf32, #tpu.memory_space<vmem>>, vector<40x16xf32>
    %44 = vector.extract_strided_slice %43 {offsets = [0, 0], sizes = [32, 16], strides = [1, 1]} : vector<40x16xf32> to vector<32x16xf32>
    %45 = vector.extract_strided_slice %43 {offsets = [32, 0], sizes = [1, 16], strides = [1, 1]} : vector<40x16xf32> to vector<1x16xf32>
    %46 = vector.broadcast %25 : vector<16x1xf32> to vector<16x32xf32>
    %47 = vector.broadcast %36 : vector<1x32xf32> to vector<16x32xf32>
    %48 = arith.mulf %46, %47 : vector<16x32xf32>
    %49 = arith.addf %29, %48 : vector<16x32xf32>
    %50 = vector.broadcast %37 : vector<1x32xf32> to vector<16x32xf32>
    %51 = arith.addf %49, %50 : vector<16x32xf32>
    %52 = arith.negf %51 : vector<16x32xf32>
    %53 = math.exp %52 : vector<16x32xf32>
    %cst_12 = arith.constant 1.000000e+00 : f32
    %54 = vector.broadcast %cst_12 : f32 to vector<16x32xf32>
    %55 = arith.addf %54, %53 : vector<16x32xf32>
    %56 = arith.divf %54, %55 : vector<16x32xf32>
    %57 = arith.mulf %51, %56 : vector<16x32xf32>
    %cst_13 = arith.constant dense<0.000000e+00> : vector<16x32xf32>
    %58 = tpu.matmul %57, %31, %cst_13 {dimension_numbers = #tpu.dot_dimension_numbers<[1], [0], [0], [1], [0, 0, 1, 1], [], []>} : vector<16x32xf32>, vector<32x32xf32>, vector<16x32xf32> -> vector<16x32xf32>
    %59 = vector.broadcast %38 : vector<1x32xf32> to vector<16x32xf32>
    %60 = arith.addf %58, %59 : vector<16x32xf32>
    %61 = arith.negf %60 : vector<16x32xf32>
    %62 = math.exp %61 : vector<16x32xf32>
    %cst_14 = arith.constant 1.000000e+00 : f32
    %63 = vector.broadcast %cst_14 : f32 to vector<16x32xf32>
    %64 = arith.addf %63, %62 : vector<16x32xf32>
    %65 = arith.divf %63, %64 : vector<16x32xf32>
    %66 = arith.mulf %60, %65 : vector<16x32xf32>
    %cst_15 = arith.constant dense<0.000000e+00> : vector<16x32xf32>
    %67 = tpu.matmul %66, %32, %cst_15 {dimension_numbers = #tpu.dot_dimension_numbers<[1], [0], [0], [1], [0, 0, 1, 1], [], []>} : vector<16x32xf32>, vector<32x32xf32>, vector<16x32xf32> -> vector<16x32xf32>
    %68 = vector.broadcast %39 : vector<1x32xf32> to vector<16x32xf32>
    %69 = arith.addf %67, %68 : vector<16x32xf32>
    %70 = arith.negf %69 : vector<16x32xf32>
    %71 = math.exp %70 : vector<16x32xf32>
    %cst_16 = arith.constant 1.000000e+00 : f32
    %72 = vector.broadcast %cst_16 : f32 to vector<16x32xf32>
    %73 = arith.addf %72, %71 : vector<16x32xf32>
    %74 = arith.divf %72, %73 : vector<16x32xf32>
    %75 = arith.mulf %69, %74 : vector<16x32xf32>
    %cst_17 = arith.constant dense<0.000000e+00> : vector<16x32xf32>
    %76 = tpu.matmul %75, %33, %cst_17 {dimension_numbers = #tpu.dot_dimension_numbers<[1], [0], [0], [1], [0, 0, 1, 1], [], []>} : vector<16x32xf32>, vector<32x32xf32>, vector<16x32xf32> -> vector<16x32xf32>
    %77 = vector.broadcast %40 : vector<1x32xf32> to vector<16x32xf32>
    %78 = arith.addf %76, %77 : vector<16x32xf32>
    %79 = arith.negf %78 : vector<16x32xf32>
    %80 = math.exp %79 : vector<16x32xf32>
    %cst_18 = arith.constant 1.000000e+00 : f32
    %81 = vector.broadcast %cst_18 : f32 to vector<16x32xf32>
    %82 = arith.addf %81, %80 : vector<16x32xf32>
    %83 = arith.divf %81, %82 : vector<16x32xf32>
    %84 = arith.mulf %78, %83 : vector<16x32xf32>
    %85 = vector.broadcast %42 : vector<1x32xf32> to vector<16x32xf32>
    %86 = arith.mulf %84, %85 : vector<16x32xf32>
    %cst_19 = arith.constant dense<0.000000e+00> : vector<16xf32>
    %87 = vector.multi_reduction <add>, %86, %cst_19 [1] : vector<16x32xf32> to vector<16xf32>
    %88 = vector.shape_cast %87 : vector<16xf32> to vector<16x1xf32>
    %89 = vector.broadcast %88 : vector<16x1xf32> to vector<16x3xf32>
    %90 = arith.mulf %22, %89 : vector<16x3xf32>
    %cst_20 = arith.constant 1.000000e+00 : f32
    %91 = vector.broadcast %cst_20 : f32 to vector<16x1xf32>
    %92 = tpu.concatenate %66, %90, %91 in 1 : vector<16x32xf32>, vector<16x3xf32>, vector<16x1xf32> -> vector<16x36xf32>
    %93 = arith.truncf %92 : vector<16x36xf32> to vector<16x36xbf16>
    %94 = vector.extract_strided_slice %12 {offsets = [0, 0], sizes = [16, 8], strides = [1, 1]} : vector<32x8xbf16> to vector<16x8xbf16>
    %cst_21 = arith.constant dense<0.000000e+00> : vector<8x36xf32>
    %95 = tpu.matmul %94, %93, %cst_21 {dimension_numbers = #tpu.dot_dimension_numbers<[0], [0], [1], [1], [0, 1, 1, 1], [], []>} : vector<16x8xbf16>, vector<16x36xbf16>, vector<8x36xf32> -> vector<8x36xf32>
    %c0_22 = arith.constant 0 : index
    %c0_23 = arith.constant 0 : index
    %96 = vector.load %arg7[%c0_22, %c0_23] : memref<8x36xf32, #tpu.memory_space<vmem>>, vector<8x36xf32>
    %97 = arith.addf %96, %95 : vector<8x36xf32>
    %c0_24 = arith.constant 0 : index
    %c0_25 = arith.constant 0 : index
    %98 = vector.load %arg7[%c0_24, %c0_25] : memref<8x36xf32, #tpu.memory_space<vmem>>, vector<8x36xf32>
    tpu.vector_store %arg7[%c0_24, %c0_25], %97 {strides = array<i32>} : memref<8x36xf32, #tpu.memory_space<vmem>>, vector<8x36xf32>,
    %c1_i32 = arith.constant 1 : i32
    %99 = arith.cmpi eq, %arg0, %c1_i32 : i32
    %100 = arith.extui %99 : i1 to i32
    %c0_i32_26 = arith.constant 0 : i32
    %101 = arith.cmpi ne, %100, %c0_i32_26 : i32
    scf.if %101 {
      %c0_27 = arith.constant 0 : index
      %c0_28 = arith.constant 0 : index
      %102 = vector.load %arg7[%c0_27, %c0_28] : memref<8x36xf32, #tpu.memory_space<vmem>>, vector<8x36xf32>
      %103 = vector.extract_strided_slice %102 {offsets = [0, 0], sizes = [8, 32], strides = [1, 1]} : vector<8x36xf32> to vector<8x32xf32>
      %104 = vector.extract_strided_slice %102 {offsets = [0, 32], sizes = [8, 3], strides = [1, 1]} : vector<8x36xf32> to vector<8x3xf32>
      %105 = vector.extract_strided_slice %102 {offsets = [0, 35], sizes = [8, 1], strides = [1, 1]} : vector<8x36xf32> to vector<8x1xf32>
      %cst_29 = arith.constant 1.000000e+00 : f32
      %106 = vector.broadcast %cst_29 : f32 to vector<8x1xf32>
      %107 = arith.maximumf %105, %106 : vector<8x1xf32>
      %108 = tpu.reciprocal %107 {approx = true} : vector<8x1xf32> -> vector<8x1xf32>
      %109 = vector.broadcast %108 : vector<8x1xf32> to vector<8x3xf32>
      %110 = arith.mulf %104, %109 : vector<8x3xf32>
      %111 = arith.addf %16, %110 : vector<8x3xf32>
      %cst_30 = arith.constant dense<0.000000e+00> : vector<8x32xf32>
      %112 = tpu.matmul %17, %35, %cst_30 {dimension_numbers = #tpu.dot_dimension_numbers<[1], [0], [0], [1], [0, 0, 1, 1], [], []>} : vector<8x16xf32>, vector<16x32xf32>, vector<8x32xf32> -> vector<8x32xf32>
      %cst_31 = arith.constant dense<0.000000e+00> : vector<8x32xf32>
      %113 = tpu.matmul %103, %34, %cst_31 {dimension_numbers = #tpu.dot_dimension_numbers<[1], [0], [0], [1], [0, 0, 1, 1], [], []>} : vector<8x32xf32>, vector<32x32xf32>, vector<8x32xf32> -> vector<8x32xf32>
      %114 = arith.addf %112, %113 : vector<8x32xf32>
      %115 = vector.broadcast %41 : vector<1x32xf32> to vector<8x32xf32>
      %116 = arith.addf %114, %115 : vector<8x32xf32>
      %117 = arith.negf %116 : vector<8x32xf32>
      %118 = math.exp %117 : vector<8x32xf32>
      %cst_32 = arith.constant 1.000000e+00 : f32
      %119 = vector.broadcast %cst_32 : f32 to vector<8x32xf32>
      %120 = arith.addf %119, %118 : vector<8x32xf32>
      %121 = arith.divf %119, %120 : vector<8x32xf32>
      %122 = arith.mulf %116, %121 : vector<8x32xf32>
      %cst_33 = arith.constant dense<0.000000e+00> : vector<8x16xf32>
      %123 = tpu.matmul %122, %44, %cst_33 {dimension_numbers = #tpu.dot_dimension_numbers<[1], [0], [0], [1], [0, 0, 1, 1], [], []>} : vector<8x32xf32>, vector<32x16xf32>, vector<8x16xf32> -> vector<8x16xf32>
      %124 = arith.addf %17, %123 : vector<8x16xf32>
      %125 = vector.broadcast %45 : vector<1x16xf32> to vector<8x16xf32>
      %126 = arith.addf %124, %125 : vector<8x16xf32>
      %127 = tpu.concatenate %126, %111 in 1 : vector<8x16xf32>, vector<8x3xf32> -> vector<8x19xf32>
      %cst_34 = arith.constant 0.000000e+00 : f32
      %128 = vector.broadcast %cst_34 : f32 to vector<8x109xf32>
      %129 = tpu.concatenate %127, %128 in 1 : vector<8x19xf32>, vector<8x109xf32> -> vector<8x128xf32>
      %c0_35 = arith.constant 0 : index
      %c0_36 = arith.constant 0 : index
      %130 = vector.load %arg6[%c0_35, %c0_36] : memref<8x128xf32, #tpu.memory_space<vmem>>, vector<8x128xf32>
      tpu.vector_store %arg6[%c0_35, %c0_36], %129 {strides = array<i32>} : memref<8x128xf32, #tpu.memory_space<vmem>>, vector<8x128xf32>,
    } else {
    }
    return
  }
  func.func @transform_0(%arg0: i32) -> (i32, i32) {
    %c0_i32 = arith.constant 0 : i32
    %c0_i32_0 = arith.constant 0 : i32
    return %arg0, %c0_i32 : i32, i32
  }
  func.func @transform_1(%arg0: i32) -> (i32, i32) {
    %c0_i32 = arith.constant 0 : i32
    %c0_i32_0 = arith.constant 0 : i32
    %c0_i32_1 = arith.constant 0 : i32
    return %c0_i32, %c0_i32_0 : i32, i32
  }
  func.func @transform_2(%arg0: i32) -> (i32, i32) {
    %c0_i32 = arith.constant 0 : i32
    %c0_i32_0 = arith.constant 0 : i32
    %c0_i32_1 = arith.constant 0 : i32
    return %c0_i32, %c0_i32_0 : i32, i32
  }
  func.func @transform_3(%arg0: i32) -> (i32, i32) {
    %c0_i32 = arith.constant 0 : i32
    %c0_i32_0 = arith.constant 0 : i32
    %c0_i32_1 = arith.constant 0 : i32
    return %c0_i32, %c0_i32_0 : i32, i32
  }
  func.func @transform_4(%arg0: i32) -> (i32, i32) {
    %c0_i32 = arith.constant 0 : i32
    %c0_i32_0 = arith.constant 0 : i32
    %c0_i32_1 = arith.constant 0 : i32
    return %c0_i32, %c0_i32_0 : i32, i32
  }
  func.func @transform_5(%arg0: i32) -> (i32, i32) {
    %c0_i32 = arith.constant 0 : i32
    %c0_i32_0 = arith.constant 0 : i32
    %c0_i32_1 = arith.constant 0 : i32
    return %c0_i32, %c0_i32_0 : i32, i32
  }
}

</mosaic_0001>

<bundles_post_ra>
// kernel: tpu_custom_call.1
= control target key start
LH: loop header
LB: loop body
LE: loop exit
PB: predicated region body
PF: predicated region fallthrough
CT: control target
= control target key end

     0   :  { %10 = vsyncpa [#allocation4], 0  ;;  %s1563_s18 = smov 0   ;;  %s1798_s0 = inlined_call_operand.vmem [shape: s32[32,2], index: 0, kind: input, shape index: {}]   ;;  %s1799_s1 = inlined_call_operand.vmem [shape: f32[8,19], index: 1, kind: input, shape index: {}]   ;;  %s1800_s2 = inlined_call_operand.vmem [shape: bf16[8,64], index: 2, kind: input, shape index: {}]   ;;  %s1801_s3 = inlined_call_operand.vmem [shape: f32[152,32], index: 3, kind: input, shape index: {}]   ;;  %s1802_s4 = inlined_call_operand.vmem [shape: f32[40,16], index: 4, kind: input, shape index: {}]   ;;  %s1803_s5 = inlined_call_operand.hbm [shape: f32[8,128], index: 5, kind: output, shape index: {}]  }
   0x1 LB: > { %s1569_s19 = sadd.s32 4294967295, %s1515_s18   ;;  %p1202_p0 = scmp.ge.s32.totalorder %s1515_s18, 1  ;;  %s1515_s18 = sphi %s1563_s18, %s16_s18  }
   0x2   : > { %p184_p1 = scmp.lt.s32.totalorder %s1515_s18, 3 }
   0x4   : > { %p185_p2 = pnand %p1202_p0, %p184_p1 }
   0x5   : > { %s1203_s20 = sshll.u32 (!%p185_p2), %s1569_s19, 1  ;;  %p1205_p4 = scmp.ne.s32.totalorder (!%p185_p2), %s1569_s19, 0 }
   0x6   : > { %188 = sbr.rel (%p185_p2) target bundleno = 2614 (0xa36), region = 40  ;;  %p208_p3 = scmp.lt.s32.totalorder (!%p185_p2), %s1203_s20, 3 }
   0xd   : > { %s1805_s20 = smov (!%p208_p3, %s1203_s20), 3  ;;  %217 = sbr.rel (%p1205_p4) target bundleno = 20 (0x14), region = 44 }
   0xe   : > { %s1204_s21 = sshll.u32 %s1805_s20, 3  ;;  %vm218_vm0 = vcmask (!%p1205_p4), 293888   ;;  %v1517_v0 = vmov (!%p1205_p4), 0.0  }
   0xf   : > { %s211_s24 = scalar_lea.vmem %s1798_s0, %s1204_s21  ;;  %219 = vst.msk [vmem:[#allocation2] sm:$0xff] (!%p1205_p4), %vm218_vm0, %v1517_v0 }
  0x14 PF: > { %v220_v1 = vld [vmem:[%s211_s24] sm:$0xff]  ;;  %s1518_s25 = smov 127   ;;  %v1519_v2 = vmov 0   ;;  %v221_v3 = vld [vmem:[%s211_s24 + $0x8] sm:$0xff]  ;;  %vm371_vm1 = vcmask 1043456   ;;  %v226_v9 = vlaneseq  ;;  %vm256_vm2 = vcmask 64512  }
  0x15   : > { %222 = vrot.lane.b32.xlu0 %v220_v1, %s1518_s25  ;;  %1433 = vset.pattern.permute.xlu1 %v1519_v2  ;;  %v1581_v4 = vld [vmem:[%s1799_s1] sm:$0xff]  ;;  %v1520_v12 = vmov 0.0   ;;  %vm358_vm7 = vcmask 23552   ;;  %s1521_s30 = smov 96   ;;  %v435_v37 = vld [vmem:[%s1801_s3 + $0x8] sm:$0xff]  ;;  %v436_v39 = vld [vmem:[%s1801_s3 + $0x10] sm:$0xff] }
  0x16   : > { %229 = vperm.xlu1 %1433, %v220_v1   ;;  %1434 = vset.pattern.permute.xlu0 %v1519_v2  ;;  %v255_v7 = vld [vmem:[%s1800_s2] sm:$0xf]  ;;  %v227_v10 = vand.u32 127, %v226_v9  ;;  %v437_v40 = vld [vmem:[%s1801_s3 + $0x18] sm:$0xff]  ;;  %v1630_v43 = vld [vmem:[%s1801_s3 + $0x68] sm:$0xff]  ;;  %v1678_v53 = vshrl.u32 %v226_v9, 7 }
  0x17   : > { %1281 = vmatprep.subr.mxu0 %v1581_v4  ;;  %1402 = vmatprep.subr.msk.bf16.mxu1 %vm371_vm1, %v255_v7  ;;  %v373_v8 = vsel %vm371_vm1, %v255_v7, 0  ;;  %v434_v36 = vld [vmem:[%s1801_s3] sm:$0xff]  ;;  %v1367_v41 = vpack.c.bf16 %v437_v40, %v436_v39  ;;  %v1635_v44 = vld [vmem:[%s1801_s3 + $0x70] sm:$0xff]  ;;  %v1640_v45 = vld [vmem:[%s1801_s3 + $0x78] sm:$0xff]  ;;  %vm490_vm8 = vcmask 261120   ;;  %vm1522_vm9 = vmmov 0  }
  0x18   : > { %1282 = vmatpush3.msra.mxu0 %v1581_v4  ;;  %1290 = vmatpush3.bf16.msra.mxu1 %v373_v8  ;;  %v1363_v38 = vpack.c.bf16 %v435_v37, %v434_v36  ;;  %v1625_v42 = vld [vmem:[%s1801_s3 + $0x60] sm:$0xff]  ;;  %v1650_v47 = vld [vmem:[%s1801_s3 + $0x88] sm:$0xff]  ;;  %v1665_v50 = vld [vmem:[%s1802_s4 + $0x10] sm:$0xff]  ;;  %v460_v54 = vsub.s32 0, %v1678_v53  ;;  %v468_v59 = vsub.s32 1, %v1678_v53  ;;  %s1523_s8 = smov 32  }
  0x19   : > { %224 = vrot.lane.b32.xlu0 %v221_v3, %s1518_s25  ;;  %v1645_v46 = vld [vmem:[%s1801_s3 + $0x80] sm:$0xff]  ;;  %v1660_v49 = vld [vmem:[%s1802_s4 + $0x8] sm:$0xff]  ;;  %v1670_v51 = vld [vmem:[%s1802_s4 + $0x18] sm:$0xff]  ;;  %vm808_vm10 = vcmask 285696   ;;  %vm828_vm11 = vcmask 130048   ;;  %vm874_vm12 = vcmask 293888  }
  0x1a   : > { %232 = vperm.xlu1 %1433, %v221_v3   ;;  %1364 = vmatprep.subr.bf16.mxu0 %v1363_v38  ;;  %v1655_v48 = vld [vmem:[%s1802_s4] sm:$0xff]  ;;  %v1684_v55 = vld [vmem:[%s1801_s3 + $0x90] sm:$0xff]  ;;  %p1231_p5 = scmp.ne.s32.totalorder %s1569_s19, 1 }
  0x1b   : > { %v1675_v52 = vld [vmem:[%s1802_s4 + $0x20] sm:$0xff]  ;;  %v461_v57 = vrot.slane %v1684_v55, %v460_v54  ;;  %v469_v62 = vrot.slane %v1684_v55, %v468_v59  ;;  %v443_v59 = vld [vmem:[%s1801_s3 + $0x48] sm:$0xff]  ;;  %s1524_s9 = smov (!%p1231_p5), 125   ;;  %vm1526_vm13 = vmmov (!%p1231_p5), 0   ;;  %s1529_s10 = smov (!%p1231_p5), 96   ;;  %vm1150_vm14 = vcmask (!%p1231_p5), 154624  }
  0x1c   : > { %s1530_s11 = smov (!%p1231_p5), 3   ;;  %s1531_s12 = smov (!%p1231_p5), 16  }
  0x87   : > { %v223_v5 = vpop.permute.xlu0 %222 }
  0x88   : > { %235 = vperm.xlu0 %1434, %v223_v5  }
  0x8b   : > { %v225_v6 = vpop.permute.xlu0 %224 }
  0x8c   : > { %238 = vperm.xlu1 %1433, %v225_v6  }
  0x95   : > { %v230_v11 = vpop.permute.xlu1 %229 }
  0x96   : > { %vm240_vm3 = vcmp.eq.s32.totalorder %v227_v10, %v230_v11 }
  0x97   : > { %v1206_v13 = vsel %vm240_vm3, 1.0, %v1520_v12 }
  0x98   : > { %1283 = vmatprep.mubr.msk.f32.mxu0 %vm256_vm2, %v1206_v13 }
  0x99   : > { %v233_v14 = vpop.permute.xlu1 %232 }
  0x9a   : > { %vm241_vm4 = vcmp.eq.s32.totalorder %v227_v10, %v233_v14 }
  0x9b   : > { %v1207_v15 = vsel %vm241_vm4, 1.0, %v1520_v12 }
  0x9c   : > { %1284 = vmatmul.mubr.msk.f32.vlgmr.msra.gmra.mrb[0].mxu0 %vm256_vm2, %v1207_v15  ;;  %v1593_v16 = vpack.c.bf16 %v1207_v15, %v1206_v13 }
  0x9d   : > { %1366 = vmatpush3.bf16.msra.mxu0 %v1363_v38 }
  0x9e   : > { %1291 = vmatprep.mubr.msk.bf16.mxu1 %vm256_vm2, %v1593_v16  ;;  %1368 = vmatprep.subr.bf16.mxu0 %v1367_v41 }
  0xa1   : > { %1370 = vmatpush3.bf16.msra.mxu0 %v1367_v41 }
 0x107   : > { %v236_v17 = vpop.permute.xlu0 %235 }
 0x108   : > { %vm242_vm5 = vcmp.eq.s32.totalorder %v227_v10, %v236_v17 }
 0x109   : > { %v1208_v18 = vsel %vm242_vm5, 1.0, %v1520_v12 }
 0x10a   : > { %1286 = vmatprep.mubr.msk.f32.mxu0 %vm256_vm2, %v1208_v18 }
 0x10b   : > { %v239_v19 = vpop.permute.xlu1 %238 }
 0x10c   : > { %vm243_vm6 = vcmp.eq.s32.totalorder %v227_v10, %v239_v19 }
 0x10d   : > { %v1209_v20 = vsel %vm243_vm6, 1.0, %v1520_v12 }
 0x10e   : > { %v253_v21 = vpack.c.bf16 %v1209_v20, %v1208_v18  ;;  %1287 = vmatmul.mubr.msk.f32.gmra.mrb[2].mxu0 %vm256_vm2, %v1209_v20  ;;  %v438_v20 = vld [vmem:[%s1801_s3 + $0x20] sm:$0xff] }
 0x110   : > { %1292 = vmatmul.mubr.msk.bf16.vlgmr.msra.gmra.mrb[0].mxu1 %vm256_vm2, %v253_v21  ;;  %v439_v21 = vld [vmem:[%s1801_s3 + $0x28] sm:$0xff] }
 0x16f   : > { %v1285_v22 = vpop.f32.mrb[0].mxu0 }
 0x170   : > { %v335_v23 = vpop.f32.mrb[1].mxu0 }
 0x1e1   : > { %v1288_v24 = vpop.f32.mrb[2].mxu0 }
 0x1e2   : > { %v1602_v25 = vsub.f32 %v1285_v22, %v1288_v24  ;;  %v345_v26 = vpop.f32.mrb[3].mxu0  ;;  %v1371_v22 = vpack.c.bf16 %v439_v21, %v438_v20  ;;  %v441_v24 = vld [vmem:[%s1801_s3 + $0x38] sm:$0xff] }
 0x1e3   : > { %v1604_v27 = vsub.f32 %v335_v23, %v345_v26  ;;  %v1293_v28 = vpop.f32.mrb[0].mxu1  ;;  %v440_v23 = vld [vmem:[%s1801_s3 + $0x30] sm:$0xff] }
 0x1e4   : > { %v409_v29 = vpop.f32.mrb[1].mxu1  ;;  %v357_v30 = vmul.f32 %v1602_v25, %v1602_v25  ;;  %1372 = vmatprep.subr.bf16.mxu1 %v1371_v22  ;;  %v1375_v26 = vpack.c.bf16 %v441_v24, %v440_v23 }
 0x1e5   : > { %v1294_v31 = vpop.f32.mrb[2].mxu1  ;;  %v356_v32 = vmul.f32 %v1604_v27, %v1604_v27  ;;  %1374 = vmatpush3.bf16.msra.mxu1 %v1371_v22 }
 0x1e6   : > { %v412_v33 = vpop.f32.mrb[3].mxu1  ;;  %v362_v34 = vsel %vm358_vm7, %v357_v30, 0.0  ;;  %1376 = vmatprep.subr.bf16.mxu1 %v1375_v26 }
 0x1e7   : > { %363 = vadd.xlane.f32.xlu0 %v362_v34  ;;  %v359_v35 = vsel %vm358_vm7, %v356_v32, 0.0 }
 0x1e8   : > { %360 = vadd.xlane.f32.xlu1 %v359_v35 }
 0x1e9   : > { %1378 = vmatpush3.bf16.msra.mxu1 %v1375_v26 }
 0x1ea   : > { %1328 = vmatprep.subr.bf16.mxu1 %v1520_v12 }
 0x1f9   : > { %428 = vrot.lane.b32.xlu1 %v1294_v31, %s1521_s30 }
 0x1fd   : > { %426 = vrot.lane.b32.xlu0 %v1293_v28, %s1521_s30  ;;  %v488_v28 = vsub.s32 2, %v1678_v53 }
 0x274   : > { %v364_v56 = vpop.xlane.xlu0 %363 }
 0x275   : > { %v361_v58 = vpop.xlane.xlu1 %360  ;;  %v463_v1 = vmul.f32 %v461_v57, %v364_v56 }
 0x276   : > { %v462_v61 = vmul.f32 %v461_v57, %v361_v58  ;;  %v442_v58 = vld [vmem:[%s1801_s3 + $0x40] sm:$0xff] }
 0x278   : > { %v427_v60 = vpop.permute.xlu0 %426 }
 0x279   : > { %v432_v63 = vadd.f32 %v427_v60, %v409_v29  ;;  %v429_v0 = vpop.permute.xlu1 %428  ;;  %v489_v29 = vrot.slane %v1684_v55, %v488_v28  ;;  %v1379_v60 = vpack.c.bf16 %v443_v59, %v442_v58 }
 0x27a   : > { %v433_v2 = vadd.f32 %v429_v0, %v412_v33  ;;  %v588_v0 = vsub.s32 3, %v1678_v53 }
 0x27b   : > { %v464_v3 = vadd.f32 %v462_v61, %v432_v63  ;;  %1380 = vmatprep.subr.bf16.mxu0 %v1379_v60  ;;  %v444_v61 = vld [vmem:[%s1801_s3 + $0x50] sm:$0xff] }
 0x27c   : > { %v465_v5 = vadd.f32 %v463_v1, %v433_v2  ;;  %v589_v1 = vrot.slane %v1684_v55, %v588_v0 }
 0x27d   : > { %v470_v6 = vadd.f32 %v469_v62, %v464_v3 }
 0x27e   : > { %v471_v7 = vadd.f32 %v469_v62, %v465_v5  ;;  %v445_v62 = vld [vmem:[%s1801_s3 + $0x58] sm:$0xff] }
 0x27f   : > { %v1216_v8 = vmul.f32 -1.442695, %v470_v6  ;;  %v1383_v63 = vpack.c.bf16 %v445_v62, %v444_v61 }
 0x280   : > { %v1217_v9 = vmul.f32 -1.442695, %v471_v7 }
 0x281   : > { %1440 = vpow2.f32 %v1216_v8 }
 0x282   : > { %1442 = vpow2.f32 %v1217_v9 }
 0x28b   : > { %v1441_v10 = vpop.eup %1440 }
 0x28c   : > { %v1443_v11 = vpop.eup %1442  ;;  %v478_v13 = vadd.f32 1.0, %v1441_v10 }
 0x28d   : > { %v479_v14 = vadd.f32 1.0, %v1443_v11 }
 0x28e   : > { %1444 = vrcp.f32 %v478_v13 }
 0x28f   : > { %1446 = vrcp.f32 %v479_v14 }
 0x298   : > { %v1445_v15 = vpop.eup %1444 }
 0x299   : > { %v1447_v17 = vpop.eup %1446  ;;  %v484_v18 = vmul.f32 %v1445_v15, %v470_v6 }
 0x29a   : > { %v485_v19 = vmul.f32 %v1447_v17, %v471_v7 }
 0x29b   : > { %1303 = vmatprep.mubr.msk.f32.mxu0 %vm490_vm8, %v484_v18 }
 0x29c   : > { %1304 = vmatmul.mubr.msk.f32.vlgmr.msra.gmra.mrb[4].mxu0 %vm490_vm8, %v485_v19  ;;  %v687_v19 = vsub.s32 4, %v1678_v53 }
 0x29d   : > { %1382 = vmatpush3.bf16.msra.mxu0 %v1379_v60 }
 0x29e   : > { %1384 = vmatprep.subr.bf16.mxu0 %v1383_v63  ;;  %v688_v20 = vrot.slane %v1684_v55, %v687_v19  ;;  %v1528_v19 = vmov (!%p1231_p5), 35  }
 0x29f   : > { %1472 = vset.pattern.permute.xlu0 (!%p1231_p5), %v1528_v19 }
 0x2a1   : > { %1386 = vmatpush3.bf16.msra.mxu0 %v1383_v63 }
 0x36f   : > { %v1305_v30 = vpop.f32.mrb[4].mxu0 }
 0x370   : > { %v569_v31 = vadd.f32 %v1305_v30, %v489_v29  ;;  %v563_v32 = vpop.f32.mrb[5].mxu0 }
 0x371   : > { %v564_v33 = vadd.f32 %v563_v32, %v489_v29 }
 0x372   : > { %v1221_v34 = vmul.f32 -1.442695, %v569_v31 }
 0x373   : > { %v1220_v35 = vmul.f32 -1.442695, %v564_v33 }
 0x374   : > { %1448 = vpow2.f32 %v1221_v34 }
 0x375   : > { %1450 = vpow2.f32 %v1220_v35 }
 0x37e   : > { %v1449_v36 = vpop.eup %1448 }
 0x37f   : > { %v1451_v37 = vpop.eup %1450  ;;  %v579_v38 = vadd.f32 1.0, %v1449_v36 }
 0x380   : > { %v578_v39 = vadd.f32 1.0, %v1451_v37 }
 0x381   : > { %1452 = vrcp.f32 %v579_v38 }
 0x382   : > { %1454 = vrcp.f32 %v578_v39 }
 0x38b   : > { %v1453_v40 = vpop.eup %1452 }
 0x38c   : > { %v1455_v41 = vpop.eup %1454  ;;  %v1710_v57 = vmul.f32 %v1453_v40, %v569_v31 }
 0x38d   : > { %v1708_v56 = vmul.f32 %v1455_v41, %v564_v33  ;;  %v786_v33 = vsub.s32 6, %v1678_v53 }
 0x38f   : > { %1314 = vmatprep.mubr.msk.f32.mxu1 %vm490_vm8, %v1708_v56  ;;  %v787_v34 = vrot.slane %v1684_v55, %v786_v33 }
 0x390   : > { %1315 = vmatmul.mubr.msk.f32.vlgmr.msra.gmra.mrb[4].mxu1 %vm490_vm8, %v1710_v57 }
 0x391   : > { %1330 = vmatprep.mubr.msk.bf16.mxu1 %vm1522_vm9, %v1520_v12 }
 0x463   : > { %v1316_v2 = vpop.f32.mrb[4].mxu1 }
 0x464   : > { %v668_v3 = vadd.f32 %v1316_v2, %v589_v1  ;;  %v662_v5 = vpop.f32.mrb[5].mxu1 }
 0x465   : > { %v663_v6 = vadd.f32 %v662_v5, %v589_v1 }
 0x466   : > { %v1225_v7 = vmul.f32 -1.442695, %v668_v3 }
 0x467   : > { %v1224_v8 = vmul.f32 -1.442695, %v663_v6 }
 0x468   : > { %1456 = vpow2.f32 %v1225_v7 }
 0x469   : > { %1458 = vpow2.f32 %v1224_v8 }
 0x472   : > { %v1457_v9 = vpop.eup %1456 }
 0x473   : > { %v1459_v10 = vpop.eup %1458  ;;  %v678_v11 = vadd.f32 1.0, %v1457_v9 }
 0x474   : > { %v677_v13 = vadd.f32 1.0, %v1459_v10 }
 0x475   : > { %1460 = vrcp.f32 %v678_v11 }
 0x476   : > { %1462 = vrcp.f32 %v677_v13  ;;  %v1525_v13 = vmov (!%p1231_p5), 0.0|0.0  }
 0x477   : > { %1387 = vmatprep.subr.bf16.mxu0 (!%p1231_p5), %v1525_v13 }
 0x47f   : > { %v1461_v14 = vpop.eup %1460 }
 0x480   : > { %v1463_v15 = vpop.eup %1462  ;;  %v684_v18 = vmul.f32 %v1461_v14, %v668_v3  ;;  %v1391_v14 = vpack.c.bf16 (!%p1231_p5), %v1640_v45, %v1635_v44  ;;  %v1397_v45 = vpack.c.bf16 (!%p1231_p5), %v1660_v49, %v1655_v48 }
 0x481   : > { %v683_v17 = vmul.f32 %v1463_v15, %v663_v6  ;;  %v1527_v15 = vmov (!%p1231_p5), 0.0  }
 0x483   : > { %1325 = vmatprep.mubr.msk.f32.mxu0 %vm490_vm8, %v683_v17  ;;  %v1400_v17 = vpack.c.bf16 (!%p1231_p5), %v1670_v51, %v1665_v50 }
 0x484   : > { %1326 = vmatmul.mubr.msk.f32.vlgmr.msra.gmra.mrb[6].mxu0 %vm490_vm8, %v684_v18 }
 0x485   : > { %1342 = vmatprep.mubr.msk.f32.mxu0 (!%p1231_p5), %vm1526_vm13, %v1527_v15 }
 0x557   : > { %v1327_v21 = vpop.f32.mrb[6].mxu0 }
 0x558   : > { %v767_v22 = vadd.f32 %v1327_v21, %v688_v20  ;;  %v761_v23 = vpop.f32.mrb[7].mxu0 }
 0x559   : > { %v762_v24 = vadd.f32 %v761_v23, %v688_v20  ;;  %v1044_v20 = vsub.s32 (!%p1231_p5), 5, %v1678_v53 }
 0x55a   : > { %v1229_v26 = vmul.f32 -1.442695, %v767_v22 }
 0x55b   : > { %v1228_v28 = vmul.f32 -1.442695, %v762_v24  ;;  %v1045_v21 = vrot.slane (!%p1231_p5), %v1684_v55, %v1044_v20  ;;  %v1135_v55 = vrot.slane (!%p1231_p5), %v1675_v52, %v460_v54 }
 0x55c   : > { %1464 = vpow2.f32 %v1229_v26 }
 0x55d   : > { %1466 = vpow2.f32 %v1228_v28 }
 0x566   : > { %v1465_v29 = vpop.eup %1464 }
 0x567   : > { %v1467_v30 = vpop.eup %1466  ;;  %v777_v31 = vadd.f32 1.0, %v1465_v29 }
 0x568   : > { %v776_v32 = vadd.f32 1.0, %v1467_v30 }
 0x569   : > { %1468 = vrcp.f32 %v777_v31 }
 0x56a   : > { %1470 = vrcp.f32 %v776_v32 }
 0x573   : > { %v1469_v35 = vpop.eup %1468 }
 0x574   : > { %v1471_v36 = vpop.eup %1470  ;;  %v783_v37 = vmul.f32 %v1469_v35, %v767_v22 }
 0x575   : > { %v782_v38 = vmul.f32 %v1471_v36, %v762_v24 }
 0x576   : > { %v789_v39 = vmul.f32 %v787_v34, %v783_v37 }
 0x577   : > { %v788_v40 = vmul.f32 %v787_v34, %v782_v38 }
 0x578   : > { %v793_v41 = vsel %vm490_vm8, %v789_v39, 0.0 }
 0x579   : > { %794 = vadd.xlane.f32.xlu0 %v793_v41  ;;  %v790_v58 = vsel %vm490_vm8, %v788_v40, 0.0 }
 0x57a   : > { %791 = vadd.xlane.f32.xlu1 %v790_v58 }
 0x5a7   : > { %812 = vxpose.xlu1.c.b16.start.end [1/1] (short) (narrow) %v1593_v16, 16 }
 0x606   : > { %v795_v59 = vpop.xlane.xlu0 %794 }
 0x607   : > { %v797_v60 = vmul.f32 %v795_v59, %v1602_v25  ;;  %v792_v61 = vpop.xlane.xlu1 %791 }
 0x608   : > { %v796_v62 = vmul.f32 %v792_v61, %v1604_v27  ;;  %v872_v27 = vld [vmem:[#allocation2] sm:$0xff] }
 0x60a   : > { %v1435_v63 = vpack.i.bf16 %v797_v60, %v796_v62 }
 0x60c   : > { %1436 = vrot.lane.b32.xlu0 %v1435_v63, %s1523_s8 }
 0x60d   : > { %v820_v25 = vpop.trf.xlu1 }
 0x610   : > { %968 = vrot.lane.b32.xlu0 (!%p1231_p5), %v1581_v4, %s1524_s9 }
 0x67e   : > { %v1437_v0 = vpop.permute.xlu0 %1436 }
 0x67f   : > { %v1439_v1 = vunpack.i.h.bf16 %v1437_v0  ;;  %v1438_v2 = vunpack.i.l.bf16 %v1437_v0 }
 0x681   : > { %v807_v3 = vsel %vm490_vm8, %v1710_v57, %v1439_v1  ;;  %v806_v16 = vsel %vm490_vm8, %v1708_v56, %v1438_v2  ;;  %v1388_v56 = vpack.c.bf16 (!%p1231_p5), %v1630_v43, %v1625_v42  ;;  %v1394_v57 = vpack.c.bf16 (!%p1231_p5), %v1650_v47, %v1645_v46 }
 0x682   : > { %v810_v5 = vsel %vm808_vm10, %v807_v3, 1.0  ;;  %v809_v12 = vsel %vm808_vm10, %v806_v16, 1.0  ;;  %v969_v43 = vpop.permute.xlu0 (!%p1231_p5), %968 }
 0x683   : > { %v811_v6 = vpack.c.bf16 %v810_v5, %v809_v12  ;;  %1389 = vmatpush3.bf16.msra.mxu0 (!%p1231_p5), %v1388_v56 }
 0x684   : > { %1390 = vmatprep.subr.bf16.mxu0 (!%p1231_p5), %v1525_v13 }
 0x685   : > { %1329 = vmatpush3.bf16.msra.mxu1 %v811_v6 }
 0x686   : > { %1393 = vmatprep.subr.bf16.mxu1 (!%p1231_p5), %v1525_v13 }
 0x687   : > { %1392 = vmatpush3.bf16.msra.mxu0 (!%p1231_p5), %v1391_v14 }
 0x688   : > { %1331 = vmatmul.mubr.msk.bf16.vlgmr.msra.gmra.mrb[8].mxu1 %vm828_vm11, %v820_v25 }
 0x689   : > { %1395 = vmatpush3.bf16.msra.mxu1 (!%p1231_p5), %v1394_v57  ;;  %1349 = vmatprep.mubr.msk.f32.mxu1 (!%p1231_p5), %vm1526_vm13, %v1527_v15 }
 0x68a   : > { %1396 = vmatprep.subr.bf16.mxu1 (!%p1231_p5), %v1525_v13 }
 0x690   : > { %1350 = vmatmul.mubr.msk.f32.vlgmr.msra.gmra.mrb[0].mxu1 (!%p1231_p5), %vm828_vm11, %v969_v43 }
 0x691   : > { %1360 = vmatprep.mubr.msk.f32.mxu1 (!%p1231_p5), %vm1526_vm13, %v1527_v15  ;;  %1398 = vmatpush3.bf16.msra.mxu1 (!%p1231_p5), %v1397_v45 }
 0x692   : > { %1399 = vmatprep.subr.bf16.mxu1 (!%p1231_p5), %v1525_v13 }
 0x695   : > { %1401 = vmatpush3.bf16.msra.mxu1 (!%p1231_p5), %v1400_v17 }
 0x758   : > { %879 = sbr.rel (%p1231_p5) target bundleno = 2589 (0xa1d), region = 48 }
 0x75b   : > { %v866_v7 = vpop.f32.mrb[8].mxu1 }
 0x75c   : > { %v873_v8 = vadd.f32 %v872_v27, %v866_v7  ;;  %v1332_v9 = vpop.f32.mrb[9].mxu1 }
 0x75d   : > { %v869_v10 = vpop.f32.mrb[10].mxu1 }
 0x75e   : > { %875 = vst.msk [vmem:[#allocation2] sm:$0xff] %vm874_vm12, %v873_v8  ;;  %v1333_v11 = vpop.f32.mrb[11].mxu1 }
 0x763   : > { %v1038_v22 = vpop.f32.mrb[0].mxu1 }
 0x764   : > { %v1351_v24 = vpop.f32.mrb[1].mxu1 }
 0x765   : > { %v880_v42 = vld [vmem:[#allocation2] sm:$0xff] }
 0x766   : > { %1343 = vmatmul.mubr.msk.f32.vlgmr.msra.gmra.mrb[0].mxu0 %vm490_vm8, %v880_v42  ;;  %v881_v46 = vmax.f32 %v880_v42, 1.0 }
 0x768   : > { %1473 = vrcp.f32 %v881_v46 }
 0x772   : > { %v1474_v18 = vpop.eup %1473 }
 0x773   : > { %885 = vperm.xlu0 %1472, %v1474_v18  }
 0x7f2   : > { %v886_v51 = vpop.permute.xlu0 %885 }
 0x7f3   : > { %v888_v30 = vmul.f32 %v886_v51, %v880_v42 }
 0x7f5   : > { %890 = vrot.lane.b32.xlu1 %v888_v30, %s1529_s10 }
 0x839   : > { %v963_v47 = vpop.f32.mrb[0].mxu0 }
 0x83a   : > { %v1344_v44 = vpop.f32.mrb[1].mxu0  ;;  %v1039_v23 = vadd.f32 %v1038_v22, %v963_v47 }
 0x83c   : > { %v1046_v26 = vadd.f32 %v1045_v21, %v1039_v23 }
 0x83e   : > { %v1234_v28 = vmul.f32 -1.442695, %v1046_v26 }
 0x840   : > { %1475 = vpow2.f32 %v1234_v28 }
 0x84a   : > { %v1476_v48 = vpop.eup %1475 }
 0x84b   : > { %v1050_v49 = vadd.f32 1.0, %v1476_v48 }
 0x84d   : > { %1477 = vrcp.f32 %v1050_v49 }
 0x857   : > { %v1478_v29 = vpop.eup %1477 }
 0x858   : > { %v1053_v50 = vmul.f32 %v1478_v29, %v1046_v26 }
 0x85a   : > { %1361 = vmatmul.mubr.msk.f32.vlgmr.msra.gmra.mrb[2].mxu1 %vm490_vm8, %v1053_v50 }
 0x867   : > { %v891_v33 = vpop.permute.xlu1 %890 }
 0x868   : > { %v893_v34 = vadd.f32 %v891_v33, %v1581_v4 }
 0x92d   : > { %v1123_v31 = vpop.f32.mrb[2].mxu1 }
 0x92e   : > { %v1362_v32 = vpop.f32.mrb[3].mxu1  ;;  %1128 = vrot.lane.b32.xlu1 %v1123_v31, %s1530_s11 }
 0x932   : > { %1137 = vrot.lane.b32.xlu1 %v1135_v55, %s1530_s11 }
 0x936   : > { %1146 = vrot.lane.b32.xlu1 %v893_v34, %s1531_s12 }
 0x9a0   : > { %v1129_v35 = vpop.permute.xlu1 %1128 }
 0x9a1   : > { %v1131_v36 = vadd.f32 %v1129_v35, %v1581_v4 }
 0x9a4   : > { %v1138_v37 = vpop.permute.xlu1 %1137 }
 0x9a5   : > { %v1140_v38 = vadd.f32 %v1138_v37, %v1131_v36 }
 0x9a7   : > { %1142 = vrot.lane.b32.xlu0 %v1140_v38, %s1524_s9 }
 0x9a8   : > { %v1147_v39 = vpop.permute.xlu1 %1146 }
 0xa19   : > { %v1143_v40 = vpop.permute.xlu0 %1142 }
 0xa1a   : > { %v1149_v53 = vsel %vm828_vm11, %v1143_v40, %v1147_v39 }
 0xa1b   : > { %v1151_v41 = vsel %vm1150_vm14, %v1149_v53, 0.0 }
 0xa1c   : > { %1152 = vst [vmem:[#allocation3] sm:$0xff] %v1151_v41 }
 0xa1d PF: > { %p1407_p6 = scmp.eq.s32.totalorder %s1569_s19, 1  ;;  %s1532_s13 = smov [#allocation3]  }
 0xa1e   : > { %s1160_s14 = sshll.u32 %s1532_s13, 4  ;;  %s1161_s14 = int_to_ptr.vmem [resolvable:$true] %s1160_s14 }
 0xa1f   : > { %s1479_s15 = scalar_lea.vmem %s1161_s14, 128  ;;  %p1486_p10 = scmp.lt.s32.totalorder %s1161_s14, %s1161_s14 }
 0xa20   : > { %p1480_p7 = scmp.ne.s32.totalorder %s1161_s14, %s1479_s15  ;;  %p1487_p11 = scmp.lt.s32.totalorder %s1479_s15, %s1479_s15 }
 0xa22   : > { %p1481_p8 = pnand %p1480_p7, %p1407_p6  ;;  %p1488_p12 = por %p1487_p11, %p1486_p10 }
 0xa24   : > { %p1482_p9 = pneg %p1481_p8 }
 0xa26   : > { %p1489_p13 = pnand %p1488_p12, %p1482_p9 }
 0xa28   : > { %1492 = shalt.err (!%p1489_p13)
}
 0xa29   : > { %s1493_s20 = scalar_lea.hbm %s1803_s5, 128 }
 0xa2a   : > { %p1494_p0 = scmp.ne.s32.totalorder %s1803_s5, %s1493_s20  ;;  %p1499_p3 = scmp.lt.u32.totalorder %s1493_s20, %s1803_s5 }
 0xa2c   : > { %p1495_p1 = pnand %p1494_p0, %p1407_p6 }
 0xa2e   : > { %p1496_p2 = pneg %p1495_p1 }
 0xa30   : > { %p1501_p4 = pnand %p1499_p3, %p1496_p2 }
 0xa32   : > { %1504 = shalt.err (!%p1501_p4)
}
 0xa33   : > { %1404 = dma.vmem_to_hbm [thread:$0]  (%p1407_p6), %s1161_s14, 128, %s1803_s5, [#allocation4]  }
 0xa34   : > { %1510 = dma.done.wait (%p1407_p6), [#allocation4], 128  }
 0xa35   : > { %1512 = vsyncadd (%p1407_p6), [#allocation4], 4294967168 }
 0xa36 PF: > { %s16_s18 = sadd.s32 1, %s1515_s18  }
 0xa37   : > { %p13_p5 = scmp.ge.s32.totalorder %s16_s18, 4  }
 0xa39   :  { %15 = sbr.rel (!%p13_p5) target bundleno = 1 (0x1), region = 75 }
 0xa40   :  { %1173 = vsyncpa [#allocation4], 1 }
 0xa41   :  { %1175 = vsyncpa [#allocation4 + $0x1], 1 }

</bundles_post_ra>
